<compile_context>
chip_gen: v7x
topology: tpu7x:2x2x1
jax: 0.10.0
libtpu: 0.0.40
codegen_flags: <defaults>
</compile_context>

<pallas_src>
import functools
import math

import jax
import jax.numpy as jnp
from jax import lax
from jax.experimental import pallas as pl
from jax.experimental.pallas import tpu as pltpu

_LANE = 128


def _round_up(v, m):
    return (v + m - 1) // m * m


def _linear_layer(h, wt_ref, b_ref, scale, activation, valid_out):
    """One EqualLinear layer: y = (h @ w_t) * scale + b, then optional activation.

    h: (bt, in)   wt_ref: (in, out) VMEM-resident   b_ref: (1, out) f32 (lr_mul folded).
    Scale is applied to the (bt, out) output, never to the weight block.
    """
    y = jnp.dot(h, wt_ref[...], preferred_element_type=jnp.float32)
    if scale != 1.0:
        y = y * jnp.float32(scale)
    y = y + b_ref[...].astype(jnp.float32)

    if activation == "fused_lrelu":
        y = jnp.where(y >= 0, y, 0.2 * y) * math.sqrt(2.0)
    elif activation == "tanh":
        y = jnp.tanh(y)
    elif activation == "sqrt_softmax":
        if valid_out != y.shape[-1]:
            # Padded lanes must not contribute to the softmax denominator.
            mask = lax.broadcasted_iota(jnp.int32, y.shape, 1) < valid_out
            y = jnp.where(mask, y, -jnp.inf)
        y = y - jnp.max(y, axis=-1, keepdims=True)
        e = jnp.exp(y)
        denom = jnp.sum(e, axis=-1, keepdims=True)
        y = jnp.sqrt(e * pl.reciprocal(denom, approx=True))
    # activation is None: nothing else to do.
    return y


def _mlp_kernel(*refs, num_layers, scales, acts, valid_outs, compute_dtype):
    """Fused MLP: refs = (x_ref, w1_ref, b1_ref, ..., wL_ref, bL_ref, o_ref)."""
    x_ref = refs[0]
    o_ref = refs[1 + 2 * num_layers]
    h = x_ref[...]                      # keep input dtype (bf16 stays bf16 for the MXU)
    for l in range(num_layers):
        w_ref = refs[1 + 2 * l]
        b_ref = refs[2 + 2 * l]
        h = _linear_layer(h, w_ref, b_ref, scales[l], acts[l], valid_outs[l])
        if l + 1 < num_layers:
            # bias/activation math stayed f32; feed the next matmul in compute dtype.
            h = h.astype(compute_dtype)
    o_ref[...] = h.astype(o_ref.dtype)


def _run_mlp(x, layers, *, scales, acts, dims, block_batch):
    """layers: list of (w_t (in_i, out_i), bias_row (1, out_i) f32, lr_mul folded)."""
    batch = x.shape[0]
    num_layers = len(layers)
    dims_p = tuple(_round_up(d, _LANE) for d in dims)

    # Lane-dense padding of every feature dim (unmasked stores, full MXU lane width).
    xp = x if dims_p[0] == dims[0] else jnp.pad(x, ((0, 0), (0, dims_p[0] - dims[0])))
    layers_p = []
    for l, (wt, b) in enumerate(layers):
        di, do = dims[l], dims[l + 1]
        dip, dop = dims_p[l], dims_p[l + 1]
        if (dip, dop) != (di, do):
            wt = jnp.pad(wt, ((0, dip - di), (0, dop - do)))
            b = jnp.pad(b, ((0, 0), (0, dop - do)))
        layers_p.append((wt, b))
    out_p = dims_p[-1]

    # Batch tile: large to amortize per-step overhead, but >= 2 grid steps when
    # batch >= 16 so a v7x megacore can split the "parallel" axis across both TCs.
    if batch >= 16:
        bt = min(block_batch, _round_up(pl.cdiv(batch, 2), 8))
        bt = min(bt, batch)
    else:
        bt = batch

    # Shrink the tile against a conservative, v7x-safe VMEM budget.
    itemsize = x.dtype.itemsize
    weight_bytes = sum(2 * (wt.size * wt.dtype.itemsize + b.size * 4)
                       for wt, b in layers_p)

    def vmem_est(bt_):
        act_bytes = 2 * bt_ * (dims_p[0] + out_p) * itemsize   # double-buffered x / out
        tmp_bytes = 4 * bt_ * max(dims_p[1:]) * 4               # f32 intermediates (generous)
        return act_bytes + tmp_bytes + weight_bytes

    budget = 48 * 1024 * 1024
    while bt > 8 and vmem_est(bt) > budget:
        bt = max(8, _round_up(bt // 2, 8))
    grid = (pl.cdiv(batch, bt),)

    in_specs = [pl.BlockSpec((bt, dims_p[0]), lambda i: (i, 0))]   # x: tiled over batch
    for wt, b in layers_p:
        in_specs.append(pl.BlockSpec(wt.shape, lambda i: (0, 0)))  # weights VMEM-resident
        in_specs.append(pl.BlockSpec(b.shape, lambda i: (0, 0)))   # biases VMEM-resident
    out_spec = pl.BlockSpec((bt, out_p), lambda i: (i, 0))

    kernel = functools.partial(
        _mlp_kernel,
        num_layers=num_layers,
        scales=tuple(float(s) for s in scales),
        acts=tuple(acts),
        valid_outs=tuple(dims[1:]),
        compute_dtype=x.dtype,
    )

    flops = 2 * batch * sum(dims[l] * dims[l + 1] for l in range(num_layers))
    bytes_accessed = (xp.size * itemsize + batch * out_p * itemsize
                      + sum(wt.size * wt.dtype.itemsize + b.size * 4
                            for wt, b in layers_p))
    cost = pl.CostEstimate(flops=flops, transcendentals=0,
                           bytes_accessed=bytes_accessed)

    out_padded = pl.pallas_call(
        kernel,
        out_shape=jax.ShapeDtypeStruct((batch, out_p), x.dtype),
        grid=grid,
        in_specs=in_specs,
        out_specs=out_spec,
        compiler_params=pltpu.CompilerParams(
            dimension_semantics=("parallel",),
            # Raise above the 32 MiB scoped default when needed; cap at 64 MiB (v7x).
            vmem_limit_bytes=min(64 * 1024 * 1024,
                                 max(32 * 1024 * 1024, int(vmem_est(bt) * 1.5)))),
        cost_estimate=cost,
    )(xp, *[r for pair in layers_p for r in pair])

    return out_padded if out_p == dims[-1] else out_padded[:, :dims[-1]]


def three_layer_fc_forward(x, params, *, lr_mul=1.0,
                           hidden_layer_activation=None, final_activation=None,
                           block_batch=1024, fold_linear_layers=False):
    """ThreeLayerFC forward.

    x      : (batch, in_dim)
    params : ((w1, b1), (w2, b2), (w3, b3)), weight shapes (out_i, in_i), bias (out_i,)
    returns: (batch, out_dim)
    """
    (w1, b1), (w2, b2), (w3, b3) = params
    batch, in_dim = x.shape
    h1, h2, out_dim = w1.shape[0], w2.shape[0], w3.shape[0]
    lr_mul = float(lr_mul)

    def _scale(d):
        return lr_mul if d == 0 else (1.0 / math.sqrt(d)) * lr_mul

    s1, s2, s3 = _scale(in_dim), _scale(h1), _scale(h2)

    # Pre-transpose once at trace level: (out, in) -> (in, out) so the kernel's dot is
    # a canonical (bt, in) @ (in, out) MXU pass.  lr_mul folded into f32 bias rows.
    w1t, w2t, w3t = jnp.transpose(w1), jnp.transpose(w2), jnp.transpose(w3)
    b1r = (b1.astype(jnp.float32) * lr_mul).reshape(1, h1)
    b2r = (b2.astype(jnp.float32) * lr_mul).reshape(1, h2)
    b3r = (b3.astype(jnp.float32) * lr_mul).reshape(1, out_dim)

    if fold_linear_layers and hidden_layer_activation is None:
        # Fold the three linear layers into a single (in, out) matmul (pure algebra;
        # rounding order changes slightly, hence gated behind a flag).
        w1f = w1t.astype(jnp.float32) * s1
        w2f = w2t.astype(jnp.float32) * s2
        w3f = w3t.astype(jnp.float32) * s3
        wf = (w1f @ w2f) @ w3f
        bf = (b1r @ w2f + b2r) @ w3f + b3r
        layers = [(wf.astype(x.dtype), bf)]
        scales = (1.0,)
        acts = (final_activation,)
        dims = (in_dim, out_dim)
    else:
        layers = [(w1t, b1r), (w2t, b2r), (w3t, b3r)]
        scales = (s1, s2, s3)
        acts = (hidden_layer_activation, hidden_layer_activation, final_activation)
        dims = (in_dim, h1, h2, out_dim)

    return _run_mlp(x, layers, scales=scales, acts=acts, dims=dims,
                    block_batch=block_batch)


if __name__ == "__main__":
    key = jax.random.PRNGKey(0)
    ks = jax.random.split(key, 4)

    # Small shapes implied by the module: (batch, in_dim=32), hidden dims 32, out 32.
    batch, in_dim = 2, 32
    hidden_1, hidden_2, out_dim = 32, 32, 32
    lr_mul = 1.0
    bias_init = 0.1

    x = jax.random.normal(ks[0], (batch, in_dim), dtype=jnp.float32)
    # PyTorch init: weight = randn(out, in) / lr_mul ; bias filled with bias_init.
    w1 = jax.random.normal(ks[1], (hidden_1, in_dim), dtype=jnp.float32) / lr_mul
    w2 = jax.random.normal(ks[2], (hidden_2, hidden_1), dtype=jnp.float32) / lr_mul
    w3 = jax.random.normal(ks[3], (out_dim, hidden_2), dtype=jnp.float32) / lr_mul
    b1 = jnp.full((hidden_1,), bias_init, dtype=jnp.float32)
    b2 = jnp.full((hidden_2,), bias_init, dtype=jnp.float32)
    b3 = jnp.full((out_dim,), bias_init, dtype=jnp.float32)
    params = ((w1, b1), (w2, b2), (w3, b3))

    out = three_layer_fc_forward(x, params, lr_mul=lr_mul)
    out = jax.block_until_ready(out)

    # Pure-JAX reference (default config: no activations).
    def ref_linear(h, w, b, scale):
        return h @ (w * scale).T + b * lr_mul

    s1 = (1.0 / math.sqrt(in_dim)) * lr_mul
    s2 = (1.0 / math.sqrt(hidden_1)) * lr_mul
    s3 = (1.0 / math.sqrt(hidden_2)) * lr_mul
    ref = ref_linear(ref_linear(ref_linear(x, w1, b1, s1), w2, b2, s2), w3, b3, s3)

    assert out.shape == (batch, out_dim)
    assert jnp.allclose(out, ref, atol=1e-4, rtol=1e-4)

    # Optional folded single-matmul path (both activations None): same math, 1 MXU pass.
    out_folded = jax.block_until_ready(
        three_layer_fc_forward(x, params, lr_mul=lr_mul, fold_linear_layers=True))
    assert out_folded.shape == (batch, out_dim)
    assert jnp.allclose(out_folded, ref, atol=1e-3, rtol=1e-3)

    print("KERNEL_OK")
</pallas_src>

<mosaic_0001>
module attributes {stable_mosaic.version = 11 : i64} {
  func.func @_mlp_kernel(%arg0: i32, %arg1: memref<2x128xf32, #tpu.memory_space<vmem>>, %arg2: memref<128x128xf32, #tpu.memory_space<vmem>>, %arg3: memref<1x128xf32, #tpu.memory_space<vmem>>, %arg4: memref<128x128xf32, #tpu.memory_space<vmem>>, %arg5: memref<1x128xf32, #tpu.memory_space<vmem>>, %arg6: memref<128x128xf32, #tpu.memory_space<vmem>>, %arg7: memref<1x128xf32, #tpu.memory_space<vmem>>, %arg8: memref<2x128xf32, #tpu.memory_space<vmem>>) attributes {dimension_semantics = [#tpu.dimension_semantics<parallel>], iteration_bounds = array<i64: 1>, scalar_prefetch = 0 : i64, scratch_operands = 0 : i64, tpu.core_type = #tpu.core_type<tc>, window_params = [{transform_indices = @transform_0, window_bounds = array<i64: 2, 128>}, {pipeline_mode = #tpu.pipeline_mode<synchronous>, transform_indices = @transform_1, window_bounds = array<i64: 128, 128>}, {pipeline_mode = #tpu.pipeline_mode<synchronous>, transform_indices = @transform_2, window_bounds = array<i64: 1, 128>}, {pipeline_mode = #tpu.pipeline_mode<synchronous>, transform_indices = @transform_3, window_bounds = array<i64: 128, 128>}, {pipeline_mode = #tpu.pipeline_mode<synchronous>, transform_indices = @transform_4, window_bounds = array<i64: 1, 128>}, {pipeline_mode = #tpu.pipeline_mode<synchronous>, transform_indices = @transform_5, window_bounds = array<i64: 128, 128>}, {pipeline_mode = #tpu.pipeline_mode<synchronous>, transform_indices = @transform_6, window_bounds = array<i64: 1, 128>}, {transform_indices = @transform_7, window_bounds = array<i64: 2, 128>}]} {
    %c0 = arith.constant 0 : index
    %c0_0 = arith.constant 0 : index
    %0 = vector.load %arg1[%c0, %c0_0] : memref<2x128xf32, #tpu.memory_space<vmem>>, vector<2x128xf32>
    %c0_1 = arith.constant 0 : index
    %c0_2 = arith.constant 0 : index
    %1 = vector.load %arg2[%c0_1, %c0_2] : memref<128x128xf32, #tpu.memory_space<vmem>>, vector<128x128xf32>
    %cst = arith.constant dense<0.000000e+00> : vector<2x128xf32>
    %2 = tpu.matmul %0, %1, %cst {dimension_numbers = #tpu.dot_dimension_numbers<[1], [0], [0], [1], [0, 0, 1, 1], [], []>} : vector<2x128xf32>, vector<128x128xf32>, vector<2x128xf32> -> vector<2x128xf32>
    %cst_3 = arith.constant 0.176776692 : f32
    %3 = vector.broadcast %cst_3 : f32 to vector<2x128xf32>
    %4 = arith.mulf %2, %3 : vector<2x128xf32>
    %c0_4 = arith.constant 0 : index
    %c0_5 = arith.constant 0 : index
    %5 = vector.load %arg3[%c0_4, %c0_5] : memref<1x128xf32, #tpu.memory_space<vmem>>, vector<1x128xf32>
    %6 = vector.broadcast %5 : vector<1x128xf32> to vector<2x128xf32>
    %7 = arith.addf %4, %6 : vector<2x128xf32>
    %c0_6 = arith.constant 0 : index
    %c0_7 = arith.constant 0 : index
    %8 = vector.load %arg4[%c0_6, %c0_7] : memref<128x128xf32, #tpu.memory_space<vmem>>, vector<128x128xf32>
    %cst_8 = arith.constant dense<0.000000e+00> : vector<2x128xf32>
    %9 = tpu.matmul %7, %8, %cst_8 {dimension_numbers = #tpu.dot_dimension_numbers<[1], [0], [0], [1], [0, 0, 1, 1], [], []>} : vector<2x128xf32>, vector<128x128xf32>, vector<2x128xf32> -> vector<2x128xf32>
    %cst_9 = arith.constant 0.176776692 : f32
    %10 = vector.broadcast %cst_9 : f32 to vector<2x128xf32>
    %11 = arith.mulf %9, %10 : vector<2x128xf32>
    %c0_10 = arith.constant 0 : index
    %c0_11 = arith.constant 0 : index
    %12 = vector.load %arg5[%c0_10, %c0_11] : memref<1x128xf32, #tpu.memory_space<vmem>>, vector<1x128xf32>
    %13 = vector.broadcast %12 : vector<1x128xf32> to vector<2x128xf32>
    %14 = arith.addf %11, %13 : vector<2x128xf32>
    %c0_12 = arith.constant 0 : index
    %c0_13 = arith.constant 0 : index
    %15 = vector.load %arg6[%c0_12, %c0_13] : memref<128x128xf32, #tpu.memory_space<vmem>>, vector<128x128xf32>
    %cst_14 = arith.constant dense<0.000000e+00> : vector<2x128xf32>
    %16 = tpu.matmul %14, %15, %cst_14 {dimension_numbers = #tpu.dot_dimension_numbers<[1], [0], [0], [1], [0, 0, 1, 1], [], []>} : vector<2x128xf32>, vector<128x128xf32>, vector<2x128xf32> -> vector<2x128xf32>
    %cst_15 = arith.constant 0.176776692 : f32
    %17 = vector.broadcast %cst_15 : f32 to vector<2x128xf32>
    %18 = arith.mulf %16, %17 : vector<2x128xf32>
    %c0_16 = arith.constant 0 : index
    %c0_17 = arith.constant 0 : index
    %19 = vector.load %arg7[%c0_16, %c0_17] : memref<1x128xf32, #tpu.memory_space<vmem>>, vector<1x128xf32>
    %20 = vector.broadcast %19 : vector<1x128xf32> to vector<2x128xf32>
    %21 = arith.addf %18, %20 : vector<2x128xf32>
    %c0_18 = arith.constant 0 : index
    %c0_19 = arith.constant 0 : index
    %22 = vector.load %arg8[%c0_18, %c0_19] : memref<2x128xf32, #tpu.memory_space<vmem>>, vector<2x128xf32>
    tpu.vector_store %arg8[%c0_18, %c0_19], %21 {strides = array<i32>} : memref<2x128xf32, #tpu.memory_space<vmem>>, vector<2x128xf32>,
    return
  }
  func.func @transform_0(%arg0: i32) -> (i32, i32) {
    %c0_i32 = arith.constant 0 : i32
    %c0_i32_0 = arith.constant 0 : i32
    return %arg0, %c0_i32 : i32, i32
  }
  func.func @transform_1(%arg0: i32) -> (i32, i32) {
    %c0_i32 = arith.constant 0 : i32
    %c0_i32_0 = arith.constant 0 : i32
    %c0_i32_1 = arith.constant 0 : i32
    return %c0_i32, %c0_i32_0 : i32, i32
  }
  func.func @transform_2(%arg0: i32) -> (i32, i32) {
    %c0_i32 = arith.constant 0 : i32
    %c0_i32_0 = arith.constant 0 : i32
    %c0_i32_1 = arith.constant 0 : i32
    return %c0_i32, %c0_i32_0 : i32, i32
  }
  func.func @transform_3(%arg0: i32) -> (i32, i32) {
    %c0_i32 = arith.constant 0 : i32
    %c0_i32_0 = arith.constant 0 : i32
    %c0_i32_1 = arith.constant 0 : i32
    return %c0_i32, %c0_i32_0 : i32, i32
  }
  func.func @transform_4(%arg0: i32) -> (i32, i32) {
    %c0_i32 = arith.constant 0 : i32
    %c0_i32_0 = arith.constant 0 : i32
    %c0_i32_1 = arith.constant 0 : i32
    return %c0_i32, %c0_i32_0 : i32, i32
  }
  func.func @transform_5(%arg0: i32) -> (i32, i32) {
    %c0_i32 = arith.constant 0 : i32
    %c0_i32_0 = arith.constant 0 : i32
    %c0_i32_1 = arith.constant 0 : i32
    return %c0_i32, %c0_i32_0 : i32, i32
  }
  func.func @transform_6(%arg0: i32) -> (i32, i32) {
    %c0_i32 = arith.constant 0 : i32
    %c0_i32_0 = arith.constant 0 : i32
    %c0_i32_1 = arith.constant 0 : i32
    return %c0_i32, %c0_i32_0 : i32, i32
  }
  func.func @transform_7(%arg0: i32) -> (i32, i32) {
    %c0_i32 = arith.constant 0 : i32
    %c0_i32_0 = arith.constant 0 : i32
    return %arg0, %c0_i32 : i32, i32
  }
}

</mosaic_0001>

<bundles_post_ra>
// kernel: tpu_custom_call.1
= control target key start
LH: loop header
LB: loop body
LE: loop exit
PB: predicated region body
PF: predicated region fallthrough
CT: control target
= control target key end

     0   :  { %12 = vsyncpa [#allocation3], 0  ;;  %s901_s0 = inlined_call_operand.hbm [shape: f32[2,128], index: 0, kind: input, shape index: {}]   ;;  %s902_s1 = inlined_call_operand.hbm [shape: f32[128,128], index: 1, kind: input, shape index: {}]   ;;  %s903_s2 = inlined_call_operand.vmem [shape: f32[1,128], index: 2, kind: input, shape index: {}]   ;;  %s904_s3 = inlined_call_operand.hbm [shape: f32[128,128], index: 3, kind: input, shape index: {}]   ;;  %s905_s4 = inlined_call_operand.vmem [shape: f32[1,128], index: 4, kind: input, shape index: {}]   ;;  %s906_s5 = inlined_call_operand.hbm [shape: f32[128,128], index: 5, kind: input, shape index: {}]   ;;  %s907_s6 = inlined_call_operand.vmem [shape: f32[1,128], index: 6, kind: input, shape index: {}]   ;;  %s908_s7 = inlined_call_operand.hbm [shape: f32[2,128], index: 7, kind: output, shape index: {}]  }
   0x1   :  { %13 = vsyncpa [#allocation6], 0 }
   0x2   :  { %14 = vsyncpa [#allocation9], 0 }
   0x3   :  { %15 = vsyncpa [#allocation4], 0  ;;  %s743_s24 = smov [#allocation5]   ;;  %s625_s28 = scalar_lea.hbm %s902_s1, 2048 }
   0x4   :  { %s31_s25 = sshll.u32 %s743_s24, 4  ;;  %p626_p0 = scmp.ne.s32.totalorder %s902_s1, %s625_s28  ;;  %s32_s25 = int_to_ptr.vmem [resolvable:$true] %s31_s25 }
   0x5   :  { %p629_p1 = scmp.lt.u32.totalorder %s625_s28, %s902_s1 }
   0x7   :  { %p631_p2 = pnand %p629_p1, %p626_p0 }
   0x9   :  { %634 = shalt.err (!%p631_p2)
}
   0xa   :  { %s635_s10 = scalar_lea.vmem %s32_s25, 2048  ;;  %p640_p4 = scmp.lt.s32.totalorder %s32_s25, %s32_s25 }
   0xb   :  { %p636_p3 = scmp.ne.s32.totalorder %s32_s25, %s635_s10  ;;  %p641_p5 = scmp.lt.s32.totalorder %s635_s10, %s635_s10 }
   0xd   :  { %p642_p6 = por %p641_p5, %p640_p4 }
   0xf   :  { %p643_p7 = pnand %p642_p6, %p636_p3 }
  0x11   :  { %646 = shalt.err (!%p643_p7)
}
  0x12   :  { %s744_s11 = smov 128   ;;  %s745_s12 = smov 8  }
  0x13   :  { %37 = dma.hbm_to_vmem [thread:$0]  %s902_s1, 2048, %s32_s25, [#allocation6], %s744_s11, %s744_s11, %s745_s12  }
  0x14   :  { %s746_s15 = smov [#allocation2]   ;;  %s747_s17 = smov [#allocation7]  }
  0x15   :  { %s22_s16 = sshll.u32 %s746_s15, 4  ;;  %s45_s18 = sshll.u32 %s747_s17, 4  ;;  %s23_s16 = int_to_ptr.vmem [resolvable:$true] %s22_s16  ;;  %s46_s18 = int_to_ptr.vmem [resolvable:$true] %s45_s18 }
  0x16   :  { %s647_s21 = scalar_lea.hbm %s901_s0, 32 }
  0x17   :  { %p648_p8 = scmp.ne.s32.totalorder %s901_s0, %s647_s21  ;;  %p651_p9 = scmp.lt.u32.totalorder %s647_s21, %s901_s0 }
  0x19   :  { %p653_p10 = pnand %p651_p9, %p648_p8 }
  0x1b   :  { %656 = shalt.err (!%p653_p10)
}
  0x1c   :  { %s657_s1 = scalar_lea.vmem %s23_s16, 32  ;;  %p662_p12 = scmp.lt.s32.totalorder %s23_s16, %s23_s16 }
  0x1d   :  { %p658_p11 = scmp.ne.s32.totalorder %s23_s16, %s657_s1  ;;  %p663_p13 = scmp.lt.s32.totalorder %s657_s1, %s657_s1 }
  0x1f   :  { %p664_p0 = por %p663_p13, %p662_p12 }
  0x21   :  { %p665_p1 = pnand %p664_p0, %p658_p11 }
  0x23   :  { %668 = shalt.err (!%p665_p1)
}
  0x24   :  { %25 = dma.hbm_to_vmem [thread:$0]  %s901_s0, 32, %s23_s16, [#allocation3]  }
  0x25   :  { %s669_s30 = scalar_lea.hbm %s904_s3, 2048 }
  0x26   :  { %p670_p2 = scmp.ne.s32.totalorder %s904_s3, %s669_s30  ;;  %p673_p3 = scmp.lt.u32.totalorder %s669_s30, %s904_s3 }
  0x28   :  { %p675_p4 = pnand %p673_p3, %p670_p2 }
  0x2a   :  { %678 = shalt.err (!%p675_p4)
}
  0x2b   :  { %s679_s14 = scalar_lea.vmem %s46_s18, 2048  ;;  %p684_p6 = scmp.lt.s32.totalorder %s46_s18, %s46_s18 }
  0x2c   :  { %p680_p5 = scmp.ne.s32.totalorder %s46_s18, %s679_s14  ;;  %p685_p7 = scmp.lt.s32.totalorder %s679_s14, %s679_s14 }
  0x2e   :  { %p686_p8 = por %p685_p7, %p684_p6 }
  0x30   :  { %p687_p9 = pnand %p686_p8, %p680_p5 }
  0x32   :  { %690 = shalt.err (!%p687_p9)
}
  0x33   :  { %51 = dma.hbm_to_vmem [thread:$0]  %s904_s3, 2048, %s46_s18, [#allocation6], %s744_s11, %s744_s11, %s745_s12  }
  0x34   :  { %s748_s16 = smov [#allocation8]   ;;  %s691_s21 = scalar_lea.hbm %s906_s5, 2048 }
  0x35   :  { %s59_s17 = sshll.u32 %s748_s16, 4  ;;  %p692_p10 = scmp.ne.s32.totalorder %s906_s5, %s691_s21  ;;  %s60_s17 = int_to_ptr.vmem [resolvable:$true] %s59_s17 }
  0x36   :  { %p695_p11 = scmp.lt.u32.totalorder %s691_s21, %s906_s5 }
  0x38   :  { %p697_p12 = pnand %p695_p11, %p692_p10 }
  0x3a   :  { %700 = shalt.err (!%p697_p12)
}
  0x3b   :  { %s701_s1 = scalar_lea.vmem %s60_s17, 2048  ;;  %p706_p0 = scmp.lt.s32.totalorder %s60_s17, %s60_s17 }
  0x3c   :  { %p702_p13 = scmp.ne.s32.totalorder %s60_s17, %s701_s1  ;;  %p707_p1 = scmp.lt.s32.totalorder %s701_s1, %s701_s1 }
  0x3e   :  { %p708_p2 = por %p707_p1, %p706_p0 }
  0x40   :  { %p709_p3 = pnand %p708_p2, %p702_p13 }
  0x42   :  { %712 = shalt.err (!%p709_p3)
}
  0x43   :  { %65 = dma.hbm_to_vmem [thread:$0]  %s906_s5, 2048, %s60_s17, [#allocation9], %s744_s11, %s744_s11, %s745_s12  }
  0x44   :  { %735 = dma.done.wait [#allocation3], 32  }
  0x45   :  { %736 = vsyncadd [#allocation3], 4294967264 }
  0x46   :  { %737 = dma.done.wait [#allocation6], 4096  }
  0x47   :  { %738 = vsyncadd [#allocation6], 4294963200 }
  0x48   :  { %739 = dma.done.wait [#allocation9], 2048  }
  0x49   :  { %740 = vsyncadd [#allocation9], 4294965248  ;;  %v749_v0 = vmov 0.0|0.0   ;;  %vm750_vm0 = vmmov 0   ;;  %v751_v1 = vmov 0.0   ;;  %v81_v2 = vld [vmem:[#allocation5] sm:$0xff] }
  0x4a   :  { %543 = vmatprep.subr.bf16.mxu0 %v749_v0  ;;  %470 = vmatprep.mubr.msk.f32.mxu0 %vm750_vm0, %v751_v1  ;;  %v82_v3 = vld [vmem:[#allocation5 + $0x8] sm:$0xff]  ;;  %v83_v4 = vld [vmem:[#allocation5 + $0x10] sm:$0xff]  ;;  %v84_v6 = vld [vmem:[#allocation5 + $0x18] sm:$0xff]  ;;  %s752_s28 = smov [#allocation10]  }
  0x4b   :  { %567 = vmatprep.subr.bf16.mxu1 %v749_v0  ;;  %505 = vmatprep.mubr.msk.f32.mxu1 %vm750_vm0, %v751_v1  ;;  %v544_v5 = vpack.c.bf16 %v82_v3, %v81_v2  ;;  %v547_v7 = vpack.c.bf16 %v84_v6, %v83_v4  ;;  %v85_v8 = vld [vmem:[#allocation5 + $0x20] sm:$0xff]  ;;  %v86_v9 = vld [vmem:[#allocation5 + $0x28] sm:$0xff]  ;;  %v178_v12 = vld [vmem:[#allocation7 + $0x10] sm:$0xff]  ;;  %s373_s29 = sshll.u32 %s752_s28, 4  ;;  %s374_s29 = int_to_ptr.vmem [resolvable:$true] %s373_s29 }
  0x4c   :  { %v176_v10 = vld [vmem:[#allocation7] sm:$0xff]  ;;  %v177_v11 = vld [vmem:[#allocation7 + $0x8] sm:$0xff]  ;;  %v179_v13 = vld [vmem:[#allocation7 + $0x18] sm:$0xff]  ;;  %v550_v14 = vpack.c.bf16 %v86_v9, %v85_v8  ;;  %s713_s30 = scalar_lea.vmem %s374_s29, 32  ;;  %p718_p5 = scmp.lt.s32.totalorder %s374_s29, %s374_s29 }
  0x4d   :  { %545 = vmatpush3.bf16.msra.mxu0 %v544_v5  ;;  %v568_v15 = vpack.c.bf16 %v177_v11, %v176_v10  ;;  %v87_v16 = vld [vmem:[#allocation5 + $0x30] sm:$0xff]  ;;  %v88_v17 = vld [vmem:[#allocation5 + $0x38] sm:$0xff]  ;;  %v571_v18 = vpack.c.bf16 %v179_v13, %v178_v12  ;;  %v180_v19 = vld [vmem:[#allocation7 + $0x20] sm:$0xff]  ;;  %p714_p4 = scmp.ne.s32.totalorder %s374_s29, %s713_s30  ;;  %p719_p6 = scmp.lt.s32.totalorder %s713_s30, %s713_s30 }
  0x4e   :  { %546 = vmatprep.subr.bf16.mxu0 %v749_v0  ;;  %v181_v20 = vld [vmem:[#allocation7 + $0x28] sm:$0xff]  ;;  %v553_v21 = vpack.c.bf16 %v88_v17, %v87_v16  ;;  %v89_v22 = vld [vmem:[#allocation5 + $0x40] sm:$0xff]  ;;  %v182_v25 = vld [vmem:[#allocation7 + $0x30] sm:$0xff] }
  0x4f   :  { %569 = vmatpush3.bf16.msra.mxu1 %v568_v15  ;;  %v90_v23 = vld [vmem:[#allocation5 + $0x48] sm:$0xff]  ;;  %v574_v24 = vpack.c.bf16 %v181_v20, %v180_v19  ;;  %v183_v26 = vld [vmem:[#allocation7 + $0x38] sm:$0xff]  ;;  %v91_v28 = vld [vmem:[#allocation5 + $0x50] sm:$0xff]  ;;  %p720_p7 = por %p719_p6, %p718_p5 }
  0x50   :  { %570 = vmatprep.subr.bf16.mxu1 %v749_v0  ;;  %v556_v27 = vpack.c.bf16 %v90_v23, %v89_v22  ;;  %v92_v29 = vld [vmem:[#allocation5 + $0x58] sm:$0xff]  ;;  %v577_v30 = vpack.c.bf16 %v183_v26, %v182_v25  ;;  %v184_v31 = vld [vmem:[#allocation7 + $0x40] sm:$0xff]  ;;  %v185_v32 = vld [vmem:[#allocation7 + $0x48] sm:$0xff] }
  0x51   :  { %548 = vmatpush3.bf16.msra.mxu0 %v547_v7  ;;  %v559_v33 = vpack.c.bf16 %v92_v29, %v91_v28  ;;  %v93_v34 = vld [vmem:[#allocation5 + $0x60] sm:$0xff]  ;;  %v94_v35 = vld [vmem:[#allocation5 + $0x68] sm:$0xff]  ;;  %v580_v36 = vpack.c.bf16 %v185_v32, %v184_v31  ;;  %v186_v37 = vld [vmem:[#allocation7 + $0x50] sm:$0xff]  ;;  %p721_p8 = pnand %p720_p7, %p714_p4 }
  0x52   :  { %549 = vmatprep.subr.bf16.mxu0 %v749_v0  ;;  %v187_v38 = vld [vmem:[#allocation7 + $0x58] sm:$0xff]  ;;  %v562_v39 = vpack.c.bf16 %v94_v35, %v93_v34  ;;  %v95_v40 = vld [vmem:[#allocation5 + $0x70] sm:$0xff]  ;;  %v188_v43 = vld [vmem:[#allocation7 + $0x60] sm:$0xff] }
  0x53   :  { %572 = vmatpush3.bf16.msra.mxu1 %v571_v18  ;;  %v96_v41 = vld [vmem:[#allocation5 + $0x78] sm:$0xff]  ;;  %v583_v42 = vpack.c.bf16 %v187_v38, %v186_v37  ;;  %v189_v44 = vld [vmem:[#allocation7 + $0x68] sm:$0xff]  ;;  %v190_v48 = vld [vmem:[#allocation7 + $0x70] sm:$0xff] }
  0x54   :  { %573 = vmatprep.subr.bf16.mxu1 %v749_v0  ;;  %v565_v45 = vpack.c.bf16 %v96_v41, %v95_v40  ;;  %v586_v46 = vpack.c.bf16 %v189_v44, %v188_v43  ;;  %v80_v47 = vld [vmem:[#allocation2] sm:$0x3]  ;;  %v271_v51 = vld [vmem:[#allocation8] sm:$0xff]  ;;  %v272_v52 = vld [vmem:[#allocation8 + $0x8] sm:$0xff] }
  0x55   :  { %551 = vmatpush3.bf16.msra.mxu0 %v550_v14  ;;  %v191_v49 = vld [vmem:[#allocation7 + $0x78] sm:$0xff]  ;;  %v273_v53 = vld [vmem:[#allocation8 + $0x10] sm:$0xff]  ;;  %v592_v54 = vpack.c.bf16 %v272_v52, %v271_v51  ;;  %v275_v57 = vld [vmem:[#allocation8 + $0x20] sm:$0xff] }
  0x56   :  { %552 = vmatprep.subr.bf16.mxu0 %v749_v0  ;;  %v589_v50 = vpack.c.bf16 %v191_v49, %v190_v48  ;;  %v274_v55 = vld [vmem:[#allocation8 + $0x18] sm:$0xff]  ;;  %v276_v58 = vld [vmem:[#allocation8 + $0x28] sm:$0xff]  ;;  %v277_v60 = vld [vmem:[#allocation8 + $0x30] sm:$0xff] }
  0x57   :  { %575 = vmatpush3.bf16.msra.mxu1 %v574_v24  ;;  %v595_v56 = vpack.c.bf16 %v274_v55, %v273_v53  ;;  %v598_v59 = vpack.c.bf16 %v276_v58, %v275_v57  ;;  %v278_v61 = vld [vmem:[#allocation8 + $0x38] sm:$0xff]  ;;  %v279_v63 = vld [vmem:[#allocation8 + $0x40] sm:$0xff]  ;;  %v281_v3 = vld [vmem:[#allocation8 + $0x50] sm:$0xff] }
  0x58   :  { %576 = vmatprep.subr.bf16.mxu1 %v749_v0  ;;  %v601_v62 = vpack.c.bf16 %v278_v61, %v277_v60  ;;  %v282_v4 = vld [vmem:[#allocation8 + $0x58] sm:$0xff]  ;;  %v283_v6 = vld [vmem:[#allocation8 + $0x60] sm:$0xff]  ;;  %v284_v7 = vld [vmem:[#allocation8 + $0x68] sm:$0xff] }
  0x59   :  { %554 = vmatpush3.bf16.msra.mxu0 %v553_v21  ;;  %v607_v5 = vpack.c.bf16 %v282_v4, %v281_v3  ;;  %v610_v8 = vpack.c.bf16 %v284_v7, %v283_v6  ;;  %v384_v10 = vld [vmem:[%s903_s2] ss:$0 sm:$0xff]  ;;  %v285_v14 = vld [vmem:[#allocation8 + $0x70] sm:$0xff] }
  0x5a   :  { %555 = vmatprep.subr.bf16.mxu0 %v749_v0  ;;  %v286_v15 = vld [vmem:[#allocation8 + $0x78] sm:$0xff] }
  0x5b   :  { %578 = vmatpush3.bf16.msra.mxu1 %v577_v30  ;;  %v613_v16 = vpack.c.bf16 %v286_v15, %v285_v14  ;;  %v385_v18 = vld [vmem:[%s905_s4] ss:$0 sm:$0xff] }
  0x5c   :  { %579 = vmatprep.subr.bf16.mxu1 %v749_v0  ;;  %v386_v22 = vld [vmem:[%s907_s6] ss:$0 sm:$0xff] }
  0x5d   :  { %557 = vmatpush3.bf16.msra.mxu0 %v556_v27 }
  0x5e   :  { %558 = vmatprep.subr.bf16.mxu0 %v749_v0 }
  0x5f   :  { %581 = vmatpush3.bf16.msra.mxu1 %v580_v36 }
  0x60   :  { %582 = vmatprep.subr.bf16.mxu1 %v749_v0 }
  0x61   :  { %560 = vmatpush3.bf16.msra.mxu0 %v559_v33 }
  0x62   :  { %561 = vmatprep.subr.bf16.mxu0 %v749_v0 }
  0x63   :  { %584 = vmatpush3.bf16.msra.mxu1 %v583_v42 }
  0x64   :  { %585 = vmatprep.subr.bf16.mxu1 %v749_v0 }
  0x65   :  { %563 = vmatpush3.bf16.msra.mxu0 %v562_v39 }
  0x66   :  { %564 = vmatprep.subr.bf16.mxu0 %v749_v0 }
  0x67   :  { %587 = vmatpush3.bf16.msra.mxu1 %v586_v46 }
  0x68   :  { %588 = vmatprep.subr.bf16.mxu1 %v749_v0 }
  0x69   :  { %566 = vmatpush3.bf16.msra.mxu0 %v565_v45 }
  0x6a   :  { %591 = vmatprep.subr.bf16.mxu0 %v749_v0 }
  0x6b   :  { %590 = vmatpush3.bf16.msra.mxu1 %v589_v50 }
  0x6c   :  { %471 = vmatmul.mubr.f32.vlgmr.msra.gmra.mrb[0].mxu0 %v80_v47 }
  0x6d   :  { %540 = vmatprep.mubr.msk.f32.mxu0 %vm750_vm0, %v751_v1  ;;  %593 = vmatpush3.bf16.msra.mxu0 %v592_v54  ;;  %v280_v1 = vld [vmem:[#allocation8 + $0x48] sm:$0xff] }
  0x6e   :  { %594 = vmatprep.subr.bf16.mxu0 %v749_v0  ;;  %v604_v2 = vpack.c.bf16 %v280_v1, %v279_v63 }
  0x71   :  { %596 = vmatpush3.bf16.msra.mxu0 %v595_v56 }
  0x72   :  { %597 = vmatprep.subr.bf16.mxu0 %v749_v0 }
  0x75   :  { %599 = vmatpush3.bf16.msra.mxu0 %v598_v59 }
  0x76   :  { %600 = vmatprep.subr.bf16.mxu0 %v749_v0 }
  0x79   :  { %602 = vmatpush3.bf16.msra.mxu0 %v601_v62 }
  0x7a   :  { %603 = vmatprep.subr.bf16.mxu0 %v749_v0 }
  0x7d   :  { %605 = vmatpush3.bf16.msra.mxu0 %v604_v2 }
  0x7e   :  { %606 = vmatprep.subr.bf16.mxu0 %v749_v0 }
  0x81   :  { %608 = vmatpush3.bf16.msra.mxu0 %v607_v5 }
  0x82   :  { %609 = vmatprep.subr.bf16.mxu0 %v749_v0 }
  0x85   :  { %611 = vmatpush3.bf16.msra.mxu0 %v610_v8 }
  0x86   :  { %612 = vmatprep.subr.bf16.mxu0 %v749_v0 }
  0x89   :  { %614 = vmatpush3.bf16.msra.mxu0 %v613_v16 }
 0x13f   :  { %v163_v9 = vpop.f32.mrb[0].mxu0 }
 0x140   :  { %v167_v11 = vmul.f32 0.17677669, %v163_v9  ;;  %v472_v12 = vpop.f32.mrb[1].mxu0 }
 0x142   :  { %v175_v13 = vadd.f32 %v384_v10, %v167_v11 }
 0x144   :  { %506 = vmatmul.mubr.f32.vlgmr.msra.gmra.mrb[0].mxu1 %v175_v13 }
 0x217   :  { %v258_v17 = vpop.f32.mrb[0].mxu1 }
 0x218   :  { %v262_v19 = vmul.f32 0.17677669, %v258_v17  ;;  %v507_v0 = vpop.f32.mrb[1].mxu1 }
 0x21a   :  { %v270_v20 = vadd.f32 %v385_v18, %v262_v19 }
 0x21c   :  { %541 = vmatmul.mubr.f32.vlgmr.msra.gmra.mrb[2].mxu0 %v270_v20 }
 0x2ef   :  { %v353_v21 = vpop.f32.mrb[2].mxu0 }
 0x2f0   :  { %v357_v23 = vmul.f32 0.17677669, %v353_v21  ;;  %v542_v24 = vpop.f32.mrb[3].mxu0 }
 0x2f2   :  { %v365_v25 = vadd.f32 %v386_v22, %v357_v23 }
 0x2f4   :  { %366 = vst [vmem:[#allocation10] sm:$0x3] %v365_v25 }
 0x2f5   :  { %724 = shalt.err (!%p721_p8)
}
 0x2f6   :  { %s725_s9 = scalar_lea.hbm %s908_s7, 32 }
 0x2f7   :  { %p726_p9 = scmp.ne.s32.totalorder %s908_s7, %s725_s9  ;;  %p729_p10 = scmp.lt.u32.totalorder %s725_s9, %s908_s7 }
 0x2f9   :  { %p731_p11 = pnand %p729_p10, %p726_p9 }
 0x2fb   :  { %734 = shalt.err (!%p731_p11)
}
 0x2fc   :  { %376 = dma.vmem_to_hbm [thread:$0]  %s374_s29, 32, %s908_s7, [#allocation4]  }
 0x2fd   :  { %741 = dma.done.wait [#allocation4], 32  }
 0x2fe   :  { %742 = vsyncadd [#allocation4], 4294967264 }
 0x2ff   :  { %380 = vsyncpa [#allocation3], 1 }
 0x300   :  { %381 = vsyncpa [#allocation6], 1 }
 0x301   :  { %382 = vsyncpa [#allocation9], 1 }
 0x302   :  { %383 = vsyncpa [#allocation4], 1 }

</bundles_post_ra>
